<compile_context>
chip_gen: v7x
topology: tpu7x:2x2x1
jax: 0.10.0
libtpu: 0.0.40
codegen_flags: <defaults>
</compile_context>

<pallas_src>
import functools

import jax
import jax.numpy as jnp
from jax.experimental import pallas as pl
from jax.experimental.pallas import tpu as pltpu

INPUT_SIZE = 784
HIDDEN_SIZE = 100
NUM_CLASSES = 10

HIDDEN_PAD = 128   # hidden dim padded to one full 128-lane vreg
OUT_PAD = 128      # class dim padded to one full 128-lane vreg
TM_MAX = 512       # max batch-tile rows (multiple of 16 for bf16 sublanes)


def _round_up(n, m):
    return ((n + m - 1) // m) * m


def mlp_kernel(x_ref, w1_ref, b1_ref, w2_ref, b2_ref, o_ref):
    # x_ref: (TM, 784) bf16   w1_ref: (784, 128) bf16   b1_ref: (1, 128) f32
    # w2_ref: (128, 128) bf16 b2_ref: (1, 128) f32      o_ref: (TM, 128) f32
    x = x_ref[...]
    h = jnp.dot(x, w1_ref[...], preferred_element_type=jnp.float32)   # (TM, 128) f32
    h = jnp.maximum(h + b1_ref[...], 0.0)                             # bias + ReLU
    out = jnp.dot(h.astype(jnp.bfloat16), w2_ref[...],
                  preferred_element_type=jnp.float32)                 # (TM, 128) f32
    o_ref[...] = out + b2_ref[...]


@jax.jit
def neural_net_forward(x, w1, b1, w2, b2):
    """x: (B, 784) f32; w1: (784, 100); b1: (100,); w2: (100, 10); b2: (10,).

    Returns (B, 10) f32 logits, matching the PyTorch NeuralNet.forward semantics.
    """
    B = x.shape[0]
    tm = min(TM_MAX, _round_up(max(B, 1), 16))
    b_pad = _round_up(B, tm)
    grid = (b_pad // tm,)

    # Zero-pad weights/biases to lane-dense shapes (padded cols/rows contribute 0).
    w1p = jnp.zeros((INPUT_SIZE, HIDDEN_PAD), jnp.bfloat16)
    w1p = w1p.at[:, :HIDDEN_SIZE].set(w1.astype(jnp.bfloat16))
    b1p = jnp.zeros((1, HIDDEN_PAD), jnp.float32)
    b1p = b1p.at[:, :HIDDEN_SIZE].set(b1.reshape(1, -1).astype(jnp.float32))
    w2p = jnp.zeros((HIDDEN_PAD, OUT_PAD), jnp.bfloat16)
    w2p = w2p.at[:HIDDEN_SIZE, :NUM_CLASSES].set(w2.astype(jnp.bfloat16))
    b2p = jnp.zeros((1, OUT_PAD), jnp.float32)
    b2p = b2p.at[:, :NUM_CLASSES].set(b2.reshape(1, -1).astype(jnp.float32))

    # Zero-pad the batch to a multiple of the tile; stream activations as bf16.
    xp = jnp.zeros((b_pad, INPUT_SIZE), jnp.bfloat16)
    xp = xp.at[:B].set(x.astype(jnp.bfloat16))

    cost = pl.CostEstimate(
        flops=2 * b_pad * (INPUT_SIZE * HIDDEN_PAD + HIDDEN_PAD * OUT_PAD),
        transcendentals=0,
        bytes_accessed=(xp.size * 2 + w1p.size * 2 + w2p.size * 2
                        + b1p.size * 4 + b2p.size * 4 + b_pad * OUT_PAD * 4),
    )

    out = pl.pallas_call(
        mlp_kernel,
        out_shape=jax.ShapeDtypeStruct((b_pad, OUT_PAD), jnp.float32),
        grid=grid,
        in_specs=[
            # x tile streams over the batch grid (double-buffered by Pallas).
            pl.BlockSpec((tm, INPUT_SIZE), lambda i: (i, 0)),
            # Weights / biases: constant index_map -> resident in VMEM across steps.
            pl.BlockSpec((INPUT_SIZE, HIDDEN_PAD), lambda i: (0, 0)),
            pl.BlockSpec((1, HIDDEN_PAD), lambda i: (0, 0)),
            pl.BlockSpec((HIDDEN_PAD, OUT_PAD), lambda i: (0, 0)),
            pl.BlockSpec((1, OUT_PAD), lambda i: (0, 0)),
        ],
        out_specs=pl.BlockSpec((tm, OUT_PAD), lambda i: (i, 0)),
        compiler_params=pltpu.CompilerParams(
            dimension_semantics=("parallel",),   # shard batch tiles across TCs (v7x)
            vmem_limit_bytes=32 * 1024 * 1024,   # safe on v5e/v6e/v7x; usage is tiny
        ),
        cost_estimate=cost,
    )(xp, w1p, b1p, w2p, b2p)

    return out[:B, :NUM_CLASSES]


def init_params(key):
    """Deterministic init mimicking PyTorch nn.Linear default:
    U(-1/sqrt(fan_in), 1/sqrt(fan_in)) for weight and bias. Weights stored as
    (in_features, out_features) so the kernel computes y = x @ W + b directly."""
    k1, k2, k3, k4 = jax.random.split(key, 4)
    bound1 = 1.0 / (INPUT_SIZE ** 0.5)
    bound2 = 1.0 / (HIDDEN_SIZE ** 0.5)
    w1 = jax.random.uniform(k1, (INPUT_SIZE, HIDDEN_SIZE), jnp.float32,
                            minval=-bound1, maxval=bound1)
    b1 = jax.random.uniform(k2, (HIDDEN_SIZE,), jnp.float32,
                            minval=-bound1, maxval=bound1)
    w2 = jax.random.uniform(k3, (HIDDEN_SIZE, NUM_CLASSES), jnp.float32,
                            minval=-bound2, maxval=bound2)
    b2 = jax.random.uniform(k4, (NUM_CLASSES,), jnp.float32,
                            minval=-bound2, maxval=bound2)
    return w1, b1, w2, b2


if __name__ == "__main__":
    key = jax.random.PRNGKey(0)
    kx, kp = jax.random.split(key)

    batch = 8
    x = jax.random.normal(kx, (batch, INPUT_SIZE), dtype=jnp.float32)
    w1, b1, w2, b2 = init_params(kp)

    out = neural_net_forward(x, w1, b1, w2, b2)
    out = jax.block_until_ready(out)

    # Reference in plain f32 JAX (same math as the PyTorch forward).
    ref = jnp.maximum(x @ w1 + b1[None, :], 0.0) @ w2 + b2[None, :]
    assert out.shape == (batch, NUM_CLASSES)
    # bf16 activations/weights on the MXU -> loosened tolerance vs f32 reference.
    assert jnp.allclose(out, ref, atol=3e-2, rtol=3e-2), float(jnp.max(jnp.abs(out - ref)))

    print("KERNEL_OK")
</pallas_src>

<mosaic_0001>
module attributes {stable_mosaic.version = 11 : i64} {
  func.func @mlp_kernel(%arg0: i32, %arg1: memref<16x784xbf16, #tpu.memory_space<vmem>>, %arg2: memref<784x128xbf16, #tpu.memory_space<vmem>>, %arg3: memref<1x128xf32, #tpu.memory_space<vmem>>, %arg4: memref<128x128xbf16, #tpu.memory_space<vmem>>, %arg5: memref<1x128xf32, #tpu.memory_space<vmem>>, %arg6: memref<16x128xf32, #tpu.memory_space<vmem>>) attributes {dimension_semantics = [#tpu.dimension_semantics<parallel>], iteration_bounds = array<i64: 1>, scalar_prefetch = 0 : i64, scratch_operands = 0 : i64, tpu.core_type = #tpu.core_type<tc>, window_params = [{transform_indices = @transform_0, window_bounds = array<i64: 16, 784>}, {pipeline_mode = #tpu.pipeline_mode<synchronous>, transform_indices = @transform_1, window_bounds = array<i64: 784, 128>}, {pipeline_mode = #tpu.pipeline_mode<synchronous>, transform_indices = @transform_2, window_bounds = array<i64: 1, 128>}, {pipeline_mode = #tpu.pipeline_mode<synchronous>, transform_indices = @transform_3, window_bounds = array<i64: 128, 128>}, {pipeline_mode = #tpu.pipeline_mode<synchronous>, transform_indices = @transform_4, window_bounds = array<i64: 1, 128>}, {transform_indices = @transform_5, window_bounds = array<i64: 16, 128>}]} {
    %c0 = arith.constant 0 : index
    %c0_0 = arith.constant 0 : index
    %0 = vector.load %arg1[%c0, %c0_0] : memref<16x784xbf16, #tpu.memory_space<vmem>>, vector<16x784xbf16>
    %c0_1 = arith.constant 0 : index
    %c0_2 = arith.constant 0 : index
    %1 = vector.load %arg2[%c0_1, %c0_2] : memref<784x128xbf16, #tpu.memory_space<vmem>>, vector<784x128xbf16>
    %cst = arith.constant dense<0.000000e+00> : vector<16x128xf32>
    %2 = tpu.matmul %0, %1, %cst {dimension_numbers = #tpu.dot_dimension_numbers<[1], [0], [0], [1], [0, 0, 1, 1], [], []>} : vector<16x784xbf16>, vector<784x128xbf16>, vector<16x128xf32> -> vector<16x128xf32>
    %c0_3 = arith.constant 0 : index
    %c0_4 = arith.constant 0 : index
    %3 = vector.load %arg3[%c0_3, %c0_4] : memref<1x128xf32, #tpu.memory_space<vmem>>, vector<1x128xf32>
    %4 = vector.broadcast %3 : vector<1x128xf32> to vector<16x128xf32>
    %5 = arith.addf %2, %4 : vector<16x128xf32>
    %cst_5 = arith.constant 0.000000e+00 : f32
    %6 = vector.broadcast %cst_5 : f32 to vector<16x128xf32>
    %7 = arith.maximumf %5, %6 : vector<16x128xf32>
    %8 = arith.truncf %7 : vector<16x128xf32> to vector<16x128xbf16>
    %c0_6 = arith.constant 0 : index
    %c0_7 = arith.constant 0 : index
    %9 = vector.load %arg4[%c0_6, %c0_7] : memref<128x128xbf16, #tpu.memory_space<vmem>>, vector<128x128xbf16>
    %cst_8 = arith.constant dense<0.000000e+00> : vector<16x128xf32>
    %10 = tpu.matmul %8, %9, %cst_8 {dimension_numbers = #tpu.dot_dimension_numbers<[1], [0], [0], [1], [0, 0, 1, 1], [], []>} : vector<16x128xbf16>, vector<128x128xbf16>, vector<16x128xf32> -> vector<16x128xf32>
    %c0_9 = arith.constant 0 : index
    %c0_10 = arith.constant 0 : index
    %11 = vector.load %arg5[%c0_9, %c0_10] : memref<1x128xf32, #tpu.memory_space<vmem>>, vector<1x128xf32>
    %12 = vector.broadcast %11 : vector<1x128xf32> to vector<16x128xf32>
    %13 = arith.addf %10, %12 : vector<16x128xf32>
    %c0_11 = arith.constant 0 : index
    %c0_12 = arith.constant 0 : index
    %14 = vector.load %arg6[%c0_11, %c0_12] : memref<16x128xf32, #tpu.memory_space<vmem>>, vector<16x128xf32>
    tpu.vector_store %arg6[%c0_11, %c0_12], %13 {strides = array<i32>} : memref<16x128xf32, #tpu.memory_space<vmem>>, vector<16x128xf32>,
    return
  }
  func.func @transform_0(%arg0: i32) -> (i32, i32) {
    %c0_i32 = arith.constant 0 : i32
    %c0_i32_0 = arith.constant 0 : i32
    return %arg0, %c0_i32 : i32, i32
  }
  func.func @transform_1(%arg0: i32) -> (i32, i32) {
    %c0_i32 = arith.constant 0 : i32
    %c0_i32_0 = arith.constant 0 : i32
    %c0_i32_1 = arith.constant 0 : i32
    return %c0_i32, %c0_i32_0 : i32, i32
  }
  func.func @transform_2(%arg0: i32) -> (i32, i32) {
    %c0_i32 = arith.constant 0 : i32
    %c0_i32_0 = arith.constant 0 : i32
    %c0_i32_1 = arith.constant 0 : i32
    return %c0_i32, %c0_i32_0 : i32, i32
  }
  func.func @transform_3(%arg0: i32) -> (i32, i32) {
    %c0_i32 = arith.constant 0 : i32
    %c0_i32_0 = arith.constant 0 : i32
    %c0_i32_1 = arith.constant 0 : i32
    return %c0_i32, %c0_i32_0 : i32, i32
  }
  func.func @transform_4(%arg0: i32) -> (i32, i32) {
    %c0_i32 = arith.constant 0 : i32
    %c0_i32_0 = arith.constant 0 : i32
    %c0_i32_1 = arith.constant 0 : i32
    return %c0_i32, %c0_i32_0 : i32, i32
  }
  func.func @transform_5(%arg0: i32) -> (i32, i32) {
    %c0_i32 = arith.constant 0 : i32
    %c0_i32_0 = arith.constant 0 : i32
    return %arg0, %c0_i32 : i32, i32
  }
}

</mosaic_0001>

<bundles_post_ra>
// kernel: neural_net_forward.1
= control target key start
LH: loop header
LB: loop body
LE: loop exit
PB: predicated region body
PF: predicated region fallthrough
CT: control target
= control target key end

     0   :  { %v991_v38 = vmov 0.0   ;;  %vm992_vm0 = vmmov 0   ;;  %vm463_vm1 = vcmask 130048   ;;  %s1240_s1 = inlined_call_operand.vmem [shape: bf16[784,128], index: 1, kind: input, shape index: {}]   ;;  %s1241_s0 = inlined_call_operand.vmem [shape: bf16[16,784], index: 0, kind: input, shape index: {}]   ;;  %s1242_s3 = inlined_call_operand.vmem [shape: bf16[128,128], index: 3, kind: input, shape index: {}]   ;;  %s1243_s2 = inlined_call_operand.vmem [shape: f32[1,128], index: 2, kind: input, shape index: {}]   ;;  %s1244_s4 = inlined_call_operand.vmem [shape: f32[1,128], index: 4, kind: input, shape index: {}]   ;;  %s1245_s5 = inlined_call_operand.vmem [shape: f32[16,128], index: 5, kind: output, shape index: {}]  }
   0x1   :  { %v924_v0 = vld [vmem:[%s1240_s1 + $0x40] sm:$0xff]   ;;  %v928_v4 = vld [vmem:[%s1240_s1 + $0x48] sm:$0xff]   ;;  %v932_v8 = vld [vmem:[%s1240_s1 + $0x50] sm:$0xff]  }
   0x2   :  { %v925_v1 = vld [vmem:[%s1240_s1] sm:$0xff]   ;;  %819 = vmatprep.subr.bf16.mxu0 %v924_v0  ;;  %v929_v5 = vld [vmem:[%s1240_s1 + $0x8] sm:$0xff]   ;;  %v933_v9 = vld [vmem:[%s1240_s1 + $0x10] sm:$0xff]  }
   0x3   :  { %v926_v2 = vld [vmem:[%s1240_s1 + $0xc0] sm:$0xff]   ;;  %820 = vmatpush3.bf16.msra.mxu0 %v925_v1  ;;  %v930_v6 = vld [vmem:[%s1240_s1 + $0xc8] sm:$0xff]   ;;  %v934_v10 = vld [vmem:[%s1240_s1 + $0xd0] sm:$0xff]  }
   0x4   :  { %v927_v3 = vld [vmem:[%s1240_s1 + $0x80] sm:$0xff]   ;;  %841 = vmatprep.subr.bf16.mxu1 %v926_v2  ;;  %821 = vmatprep.subr.bf16.mxu0 %v928_v4  ;;  %v931_v7 = vld [vmem:[%s1240_s1 + $0x88] sm:$0xff]   ;;  %v935_v11 = vld [vmem:[%s1240_s1 + $0x90] sm:$0xff]  }
   0x5   :  { %842 = vmatpush3.bf16.msra.mxu1 %v927_v3  ;;  %v936_v12 = vld [vmem:[%s1240_s1 + $0x58] sm:$0xff]   ;;  %v940_v16 = vld [vmem:[%s1240_s1 + $0x60] sm:$0xff]   ;;  %v944_v20 = vld [vmem:[%s1240_s1 + $0x68] sm:$0xff]  }
   0x6   :  { %843 = vmatprep.subr.bf16.mxu1 %v930_v6  ;;  %v937_v13 = vld [vmem:[%s1240_s1 + $0x18] sm:$0xff]   ;;  %v941_v17 = vld [vmem:[%s1240_s1 + $0x20] sm:$0xff]   ;;  %v945_v21 = vld [vmem:[%s1240_s1 + $0x28] sm:$0xff]  }
   0x7   :  { %822 = vmatpush3.bf16.msra.mxu0 %v929_v5  ;;  %v938_v14 = vld [vmem:[%s1240_s1 + $0xd8] sm:$0xff]   ;;  %v942_v18 = vld [vmem:[%s1240_s1 + $0xe0] sm:$0xff]   ;;  %v946_v22 = vld [vmem:[%s1240_s1 + $0xe8] sm:$0xff]  }
   0x8   :  { %823 = vmatprep.subr.bf16.mxu0 %v932_v8  ;;  %v939_v15 = vld [vmem:[%s1240_s1 + $0x98] sm:$0xff]   ;;  %v943_v19 = vld [vmem:[%s1240_s1 + $0xa0] sm:$0xff]   ;;  %v947_v23 = vld [vmem:[%s1240_s1 + $0xa8] sm:$0xff]  }
   0x9   :  { %844 = vmatpush3.bf16.msra.mxu1 %v931_v7  ;;  %v948_v24 = vld [vmem:[%s1240_s1 + $0x70] sm:$0xff]   ;;  %v952_v28 = vld [vmem:[%s1240_s1 + $0x78] sm:$0xff]   ;;  %v957_v32 = vld [vmem:[%s1241_s0 + $0x4] ss:$28 sps:$4 sm:$0xff]  }
   0xa   :  { %845 = vmatprep.subr.bf16.mxu1 %v934_v10  ;;  %v949_v25 = vld [vmem:[%s1240_s1 + $0x30] sm:$0xff]   ;;  %v953_v29 = vld [vmem:[%s1240_s1 + $0x38] sm:$0xff]   ;;  %499 = vmatprep.mubr.bf16.mxu0 %v957_v32  ;;  %v959_v34 = vld [vmem:[%s1240_s1 + $0x140] sm:$0xff]  }
   0xb   :  { %824 = vmatpush3.bf16.msra.mxu0 %v933_v9  ;;  %v950_v26 = vld [vmem:[%s1240_s1 + $0xf0] sm:$0xff]   ;;  %v954_v30 = vld [vmem:[%s1240_s1 + $0xf8] sm:$0xff]   ;;  %v960_v35 = vld [vmem:[%s1241_s0 + $0x8] ss:$28 sps:$4 sm:$0xff]  }
   0xc   :  { %825 = vmatprep.subr.bf16.mxu0 %v936_v12  ;;  %v951_v27 = vld [vmem:[%s1240_s1 + $0xb0] sm:$0xff]   ;;  %v955_v31 = vld [vmem:[%s1241_s0] ss:$28 sps:$4 sm:$0xff]   ;;  %v962_v36 = vld [vmem:[%s1241_s0 + $0xc] ss:$28 sps:$4 sm:$0xff]  }
   0xd   :  { %846 = vmatpush3.bf16.msra.mxu1 %v935_v11  ;;  %v958_v33 = vld [vmem:[%s1240_s1 + $0xb8] sm:$0xff]   ;;  %v963_v37 = vld [vmem:[%s1240_s1 + $0x100] sm:$0xff]   ;;  %540 = vmatprep.mubr.bf16.mxu1 %v962_v36  ;;  %v964_v39 = vld [vmem:[%s1240_s1 + $0x148] sm:$0xff]  }
   0xe   :  { %847 = vmatprep.subr.bf16.mxu1 %v938_v14  ;;  %v965_v40 = vld [vmem:[%s1240_s1 + $0x108] sm:$0xff]   ;;  %v966_v41 = vld [vmem:[%s1240_s1 + $0x150] sm:$0xff]   ;;  %v968_v43 = vld [vmem:[%s1240_s1 + $0x158] sm:$0xff]  }
   0xf   :  { %826 = vmatpush3.bf16.msra.mxu0 %v937_v13  ;;  %v967_v42 = vld [vmem:[%s1240_s1 + $0x110] sm:$0xff]   ;;  %v969_v44 = vld [vmem:[%s1240_s1 + $0x118] sm:$0xff]   ;;  %v970_v45 = vld [vmem:[%s1240_s1 + $0x160] sm:$0xff]  }
  0x10   :  { %827 = vmatprep.subr.bf16.mxu0 %v940_v16  ;;  %v971_v46 = vld [vmem:[%s1240_s1 + $0x120] sm:$0xff]   ;;  %v972_v47 = vld [vmem:[%s1240_s1 + $0x168] sm:$0xff]   ;;  %v981_v49 = vld [vmem:[%s1241_s0 + $0x14] ss:$28 sps:$4 sm:$0xff]  }
  0x11   :  { %848 = vmatpush3.bf16.msra.mxu1 %v939_v15  ;;  %v978_v48 = vld [vmem:[%s1240_s1 + $0x180] sm:$0xff]   ;;  %v982_v50 = vld [vmem:[%s1241_s0 + $0x18] ss:$28 sps:$4 sm:$0xff]   ;;  %v973_v51 = vld [vmem:[%s1240_s1 + $0x128] sm:$0xff]  }
  0x12   :  { %849 = vmatprep.subr.bf16.mxu1 %v942_v18  ;;  %v974_v52 = vld [vmem:[%s1240_s1 + $0x170] sm:$0xff]   ;;  %v976_v54 = vld [vmem:[%s1240_s1 + $0x178] sm:$0xff]   ;;  %v983_v57 = vld [vmem:[%s1242_s3] sm:$0xff]  }
  0x13   :  { %828 = vmatpush3.bf16.msra.mxu0 %v941_v17  ;;  %v975_v53 = vld [vmem:[%s1240_s1 + $0x130] sm:$0xff]   ;;  %v977_v55 = vld [vmem:[%s1240_s1 + $0x138] sm:$0xff]   ;;  %v984_v58 = vld [vmem:[%s1242_s3 + $0x8] sm:$0xff]  }
  0x14   :  { %829 = vmatprep.subr.bf16.mxu0 %v944_v20  ;;  %v979_v56 = vld [vmem:[%s1241_s0 + $0x10] ss:$28 sps:$4 sm:$0xff]   ;;  %v986_v60 = vld [vmem:[%s1242_s3 + $0x18] sm:$0xff]   ;;  %v987_v61 = vld [vmem:[%s1242_s3 + $0x20] sm:$0xff]  }
  0x15   :  { %850 = vmatpush3.bf16.msra.mxu1 %v943_v19  ;;  %v985_v59 = vld [vmem:[%s1242_s3 + $0x10] sm:$0xff]   ;;  %v988_v62 = vld [vmem:[%s1242_s3 + $0x28] sm:$0xff]   ;;  %v990_v0 = vld [vmem:[%s1242_s3 + $0x38] sm:$0xff]  }
  0x16   :  { %851 = vmatprep.subr.bf16.mxu1 %v946_v22  ;;  %v989_v63 = vld [vmem:[%s1242_s3 + $0x30] sm:$0xff]   ;;  %v752_v2 = vld [vmem:[%s1243_s2] ss:$0 sm:$0xff] }
  0x17   :  { %830 = vmatpush3.bf16.msra.mxu0 %v945_v21 }
  0x18   :  { %831 = vmatprep.subr.bf16.mxu0 %v948_v24 }
  0x19   :  { %852 = vmatpush3.bf16.msra.mxu1 %v947_v23 }
  0x1a   :  { %853 = vmatprep.subr.bf16.mxu1 %v950_v26 }
  0x1b   :  { %832 = vmatpush3.bf16.msra.mxu0 %v949_v25 }
  0x1c   :  { %833 = vmatprep.subr.bf16.mxu0 %v952_v28 }
  0x1d   :  { %854 = vmatpush3.bf16.msra.mxu1 %v951_v27 }
  0x1e   :  { %855 = vmatprep.subr.bf16.mxu1 %v954_v30 }
  0x1f   :  { %834 = vmatpush3.bf16.msra.mxu0 %v953_v29 }
  0x20   :  { %863 = vmatprep.subr.bf16.mxu0 %v959_v34 }
  0x21   :  { %856 = vmatpush3.bf16.msra.mxu1 %v958_v33 }
  0x22   :  { %500 = vmatmul.mubr.bf16.vlgmr.msra.gmra.mrb[0].mxu0 %v955_v31  ;;  %896 = vmatprep.subr.bf16.mxu1 %v991_v38 }
  0x23   :  { %864 = vmatpush3.bf16.msra.mxu0 %v963_v37  ;;  %581 = vmatprep.mubr.bf16.mxu0 %v981_v49 }
  0x24   :  { %541 = vmatmul.mubr.bf16.vlgmr.msra.gmra.mrb[0].mxu1 %v960_v35  ;;  %865 = vmatprep.subr.bf16.mxu0 %v964_v39  ;;  %v810_v35 = vld [vmem:[%s1244_s4] ss:$0 sm:$0xff] }
  0x25   :  { %898 = vmatprep.mubr.msk.bf16.mxu1 %vm992_vm0, %v991_v38  ;;  %897 = vmatpush3.bf16.msra.mxu1 %v978_v48 }
  0x26   :  { %902 = vmatprep.subr.bf16.mxu1 %v991_v38 }
  0x27   :  { %866 = vmatpush3.bf16.msra.mxu0 %v965_v40 }
  0x28   :  { %867 = vmatprep.subr.bf16.mxu0 %v966_v41 }
  0x2b   :  { %868 = vmatpush3.bf16.msra.mxu0 %v967_v42 }
  0x2c   :  { %869 = vmatprep.subr.bf16.mxu0 %v968_v43  ;;  %899 = vmatmul.mubr.msk.bf16.vlgmr.msra.gmra.mrb[4].mxu1 %vm463_vm1, %v982_v50 }
  0x2d   :  { %918 = vmatprep.mubr.msk.bf16.mxu1 %vm992_vm0, %v991_v38  ;;  %903 = vmatpush3.bf16.msra.mxu1 %v983_v57 }
  0x2e   :  { %904 = vmatprep.subr.bf16.mxu1 %v991_v38 }
  0x2f   :  { %870 = vmatpush3.bf16.msra.mxu0 %v969_v44 }
  0x30   :  { %871 = vmatprep.subr.bf16.mxu0 %v970_v45 }
  0x31   :  { %905 = vmatpush3.bf16.msra.mxu1 %v984_v58 }
  0x32   :  { %906 = vmatprep.subr.bf16.mxu1 %v991_v38 }
  0x33   :  { %872 = vmatpush3.bf16.msra.mxu0 %v971_v46 }
  0x34   :  { %873 = vmatprep.subr.bf16.mxu0 %v972_v47 }
  0x35   :  { %907 = vmatpush3.bf16.msra.mxu1 %v985_v59 }
  0x36   :  { %908 = vmatprep.subr.bf16.mxu1 %v991_v38 }
  0x37   :  { %874 = vmatpush3.bf16.msra.mxu0 %v973_v51 }
  0x38   :  { %875 = vmatprep.subr.bf16.mxu0 %v974_v52 }
  0x39   :  { %909 = vmatpush3.bf16.msra.mxu1 %v986_v60 }
  0x3a   :  { %910 = vmatprep.subr.bf16.mxu1 %v991_v38 }
  0x3b   :  { %876 = vmatpush3.bf16.msra.mxu0 %v975_v53 }
  0x3c   :  { %877 = vmatprep.subr.bf16.mxu0 %v976_v54 }
  0x3d   :  { %911 = vmatpush3.bf16.msra.mxu1 %v987_v61 }
  0x3e   :  { %912 = vmatprep.subr.bf16.mxu1 %v991_v38 }
  0x3f   :  { %878 = vmatpush3.bf16.msra.mxu0 %v977_v55 }
  0x41   :  { %913 = vmatpush3.bf16.msra.mxu1 %v988_v62 }
  0x42   :  { %582 = vmatmul.mubr.bf16.vlgmr.msra.gmra.mrb[4].mxu0 %v979_v56  ;;  %914 = vmatprep.subr.bf16.mxu1 %v991_v38 }
  0x45   :  { %915 = vmatpush3.bf16.msra.mxu1 %v989_v63 }
  0x46   :  { %916 = vmatprep.subr.bf16.mxu1 %v991_v38 }
  0x49   :  { %917 = vmatpush3.bf16.msra.mxu1 %v990_v0 }
  0xf5   :  { %v835_v1 = vpop.f32.mrb[0].mxu0 }
  0xf6   :  { %v836_v3 = vpop.f32.mrb[1].mxu0 }
  0xf7   :  { %v837_v4 = vadd.f32 %v836_v3, %v835_v1  ;;  %v838_v5 = vpop.f32.mrb[2].mxu0  ;;  %v857_v6 = vpop.f32.mrb[0].mxu1 }
  0xf8   :  { %v839_v7 = vpop.f32.mrb[3].mxu0  ;;  %v858_v10 = vpop.f32.mrb[1].mxu1 }
  0xf9   :  { %v502_v8 = vadd.f32 %v837_v4, %v752_v2  ;;  %v840_v9 = vadd.f32 %v839_v7, %v838_v5  ;;  %v859_v11 = vadd.f32 %v858_v10, %v857_v6  ;;  %v860_v12 = vpop.f32.mrb[2].mxu1 }
  0xfa   :  { %v861_v14 = vpop.f32.mrb[3].mxu1 }
  0xfb   :  { %v505_v13 = vadd.f32 %v840_v9, %v752_v2  ;;  %v543_v15 = vadd.f32 %v859_v11, %v502_v8  ;;  %v862_v16 = vadd.f32 %v861_v14, %v860_v12 }
  0xfd   :  { %v546_v17 = vadd.f32 %v862_v16, %v505_v13 }
  0xff   :  { %v624_v18 = vpop.f32.mrb[4].mxu1 }
 0x100   :  { %v900_v19 = vpop.f32.mrb[5].mxu1 }
 0x101   :  { %v627_v20 = vpop.f32.mrb[6].mxu1 }
 0x102   :  { %v901_v21 = vpop.f32.mrb[7].mxu1 }
 0x115   :  { %v879_v22 = vpop.f32.mrb[4].mxu0 }
 0x116   :  { %v880_v23 = vpop.f32.mrb[5].mxu0 }
 0x117   :  { %v881_v24 = vadd.f32 %v880_v23, %v879_v22  ;;  %v882_v25 = vpop.f32.mrb[6].mxu0 }
 0x118   :  { %v883_v26 = vpop.f32.mrb[7].mxu0 }
 0x119   :  { %v584_v27 = vadd.f32 %v881_v24, %v543_v15  ;;  %v884_v28 = vadd.f32 %v883_v26, %v882_v25 }
 0x11b   :  { %v625_v29 = vadd.f32 %v624_v18, %v584_v27  ;;  %v587_v30 = vadd.f32 %v884_v28, %v546_v17 }
 0x11d   :  { %v628_v31 = vadd.f32 %v627_v20, %v587_v30  ;;  %v631_v32 = vmax.f32 %v625_v29, 0.0 }
 0x11f   :  { %v632_v33 = vmax.f32 %v628_v31, 0.0 }
 0x121   :  { %v633_v34 = vpack.c.bf16 %v632_v33, %v631_v32 }
 0x123   :  { %919 = vmatmul.mubr.bf16.vlgmr.msra.gmra.mrb[8].mxu1 %v633_v34 }
 0x1f6   :  { %v739_v36 = vpop.f32.mrb[8].mxu1 }
 0x1f7   :  { %v740_v37 = vadd.f32 %v810_v35, %v739_v36  ;;  %v920_v38 = vpop.f32.mrb[9].mxu1 }
 0x1f8   :  { %v742_v39 = vpop.f32.mrb[10].mxu1 }
 0x1f9   :  { %746 = vst [vmem:[%s1245_s5] sm:$0xff] %v740_v37  ;;  %v743_v40 = vadd.f32 %v810_v35, %v742_v39  ;;  %v921_v41 = vpop.f32.mrb[11].mxu1 }
 0x1fb   :  { %747 = vst [vmem:[%s1245_s5 + $0x8] sm:$0xff] %v743_v40 }

</bundles_post_ra>
